<compile_context>
chip_gen: v6e
topology: v6e:2x2x1
jax: 0.10.0
libtpu: 0.0.40
codegen_flags: <defaults>
</compile_context>

<pallas_src>
import jax
import jax.numpy as jnp
from jax.experimental import pallas as pl
from jax.experimental.pallas import tpu as pltpu

_LANE = 128


def _hpe_kernel(x_ref, cen_ref, out_ref):
    # x_ref  : (1, C, TN) block in VMEM (TN multiple of 128 -> lane dense)
    # cen_ref: (1, C, 1)  center-spectrum block in VMEM
    # out_ref: (1, 1, TN) block in VMEM
    x = x_ref[0].astype(jnp.float32)        # (C, TN)
    cen = cen_ref[0].astype(jnp.float32)    # (C, 1)

    # ---- per-position min/max normalization over the channel axis ----------
    min_c = jnp.min(x, axis=0, keepdims=True)                       # (1, TN)
    max_c = jnp.max(x, axis=0, keepdims=True)                       # (1, TN)
    xn = (x - min_c) * pl.reciprocal(max_c - min_c + 1e-8, approx=True)

    cmin = jnp.min(cen, axis=0, keepdims=True)                      # (1, 1)
    cmax = jnp.max(cen, axis=0, keepdims=True)                      # (1, 1)
    cenn = (cen - cmin) * pl.reciprocal(cmax - cmin + 1e-8, approx=True)

    # ---- SID (spectral information divergence), one log per element --------
    # NOTE: for very large C these channel-axis sums could be offloaded to the
    # otherwise-idle MXU via ones(1, C) @ (...); kept on the XLU here since
    # typical HSI band counts keep the sublane reduce cheap.
    y_true = cenn + 1e-7                                             # (C, 1)
    y_pred = xn + 1e-7                                               # (C, TN)
    p_n = y_true * pl.reciprocal(
        jnp.sum(y_true, axis=0, keepdims=True), approx=True)         # (C, 1)
    q_n = y_pred * pl.reciprocal(
        jnp.sum(y_pred, axis=0, keepdims=True), approx=True)         # (C, TN)
    log_ratio = jnp.log(p_n) - jnp.log(q_n)                          # (C, TN)
    sid = jnp.sum((p_n - q_n) * log_ratio, axis=0, keepdims=True)    # (1, TN)

    # ---- SAD -> tan(arccos(c)) = sqrt(1 - c^2) / c --------------------------
    dot = jnp.sum(cenn * xn, axis=0, keepdims=True)                  # (1, TN)
    ss_cen = jnp.sum(cenn * cenn, axis=0, keepdims=True)             # (1, 1)
    ss_nei = jnp.sum(xn * xn, axis=0, keepdims=True)                 # (1, TN)
    cos_a = dot * jax.lax.rsqrt(ss_cen * ss_nei)                     # (1, TN)
    tan_sad = (jnp.sqrt(jnp.maximum(1.0 - cos_a * cos_a, 0.0))
               * pl.reciprocal(cos_a, approx=True))                  # (1, TN)

    hybrid = 1.0 - sid * tan_sad                                     # (1, TN)

    # ---- truncation + conv1d(ones, width 1) + softmax over singleton dim ---
    # For finite hybrid this chain is identically 1.0; non-finite hybrid
    # (degenerate columns) is surfaced as NaN.
    finite = jnp.abs(hybrid) < jnp.float32(jnp.inf)   # False for NaN and +-Inf
    out = jnp.where(finite, jnp.float32(1.0), jnp.float32(jnp.nan))

    out_ref[0] = out.astype(out_ref.dtype)


def _pick_tile_n(C: int, N: int) -> int:
    """Largest lane-multiple N-tile with a (C, TN) f32 block <= ~2 MiB/buffer.

    Keeps double-buffered in/out blocks + kernel temporaries well inside
    scoped VMEM on all of v5e / v6e / v7x while staying lane-dense.
    """
    per_buffer_budget = 2 * 1024 * 1024
    cap = max(_LANE, (per_buffer_budget // (C * 4)) // _LANE * _LANE)
    cap = min(cap, 4096)          # bound padded-tail waste on awkward N
    n_lane = pl.cdiv(N, _LANE) * _LANE
    return min(cap, n_lane)


def hybrid_position_embedding(x, *, patch_size: int = 1):
    """x: (B, C, N) float array. Returns (B, 1, N) (softmax over dim=1)."""
    if patch_size != 1:
        # TODO(synk): windowed ones-kernel conv1d for patch_size > 1 (the
        # reference module hard-codes patch_size = 1, i.e. identity).
        raise NotImplementedError("only patch_size=1 is implemented")

    B, C, N = x.shape
    cen_idx = (N - 1) // 2

    # Hoist the center spectrum out of the kernel -> removes the cross-tile
    # dependency on column cen_idx and makes the N axis freely tileable.
    cen = x[:, :, cen_idx:cen_idx + 1]                     # (B, C, 1)

    tn = _pick_tile_n(C, N)
    n_pad = pl.cdiv(N, tn) * tn
    x_p = x if n_pad == N else jnp.pad(x, ((0, 0), (0, 0), (0, n_pad - N)))

    out = pl.pallas_call(
        _hpe_kernel,
        out_shape=jax.ShapeDtypeStruct((B, 1, n_pad), x.dtype),
        grid=(B, n_pad // tn),
        in_specs=[
            pl.BlockSpec((1, C, tn), lambda b, n: (b, 0, n)),
            pl.BlockSpec((1, C, 1), lambda b, n: (b, 0, 0)),
        ],
        out_specs=pl.BlockSpec((1, 1, tn), lambda b, n: (b, 0, n)),
        compiler_params=pltpu.CompilerParams(
            dimension_semantics=("parallel", "parallel"),
            vmem_limit_bytes=32 * 1024 * 1024,
        ),
    )(x_p, cen)

    return out[:, :, :N]


if __name__ == "__main__":
    key = jax.random.PRNGKey(0)
    B, C, N = 2, 32, 16   # batch, spectral bands, spatial positions
    x = jax.random.normal(key, (B, C, N), dtype=jnp.float32)

    out = hybrid_position_embedding(x)
    out = jax.block_until_ready(out)

    assert out.shape == (B, 1, N), out.shape
    # Reference semantics: softmax over a singleton dim -> all ones for
    # non-degenerate inputs.
    assert bool(jnp.allclose(out, jnp.ones_like(out))), out

    print("KERNEL_OK")
</pallas_src>

<mosaic_0001>
module attributes {stable_mosaic.version = 11 : i64} {
  func.func @_hpe_kernel(%arg0: i32, %arg1: i32, %arg2: memref<1x32x128xf32, #tpu.memory_space<vmem>>, %arg3: memref<1x32x1xf32, #tpu.memory_space<vmem>>, %arg4: memref<1x1x128xf32, #tpu.memory_space<vmem>>) attributes {dimension_semantics = [#tpu.dimension_semantics<parallel>, #tpu.dimension_semantics<parallel>], iteration_bounds = array<i64: 2, 1>, scalar_prefetch = 0 : i64, scratch_operands = 0 : i64, tpu.core_type = #tpu.core_type<tc>, window_params = [{transform_indices = @transform_0, window_bounds = array<i64: 1, 32, 128>}, {transform_indices = @transform_1, window_bounds = array<i64: 1, 32, 1>}, {transform_indices = @transform_2, window_bounds = array<i64: 1, 1, 128>}]} {
    %c0 = arith.constant 0 : index
    %c0_0 = arith.constant 0 : index
    %c0_1 = arith.constant 0 : index
    %0 = vector.load %arg2[%c0, %c0_0, %c0_1] : memref<1x32x128xf32, #tpu.memory_space<vmem>>, vector<1x32x128xf32>
    %1 = vector.shape_cast %0 : vector<1x32x128xf32> to vector<32x128xf32>
    %c0_2 = arith.constant 0 : index
    %c0_3 = arith.constant 0 : index
    %c0_4 = arith.constant 0 : index
    %2 = vector.load %arg3[%c0_2, %c0_3, %c0_4] : memref<1x32x1xf32, #tpu.memory_space<vmem>>, vector<1x32x1xf32>
    %3 = vector.shape_cast %2 : vector<1x32x1xf32> to vector<32x1xf32>
    %cst = arith.constant dense<0x7F800000> : vector<128xf32>
    %4 = vector.multi_reduction <minimumf>, %1, %cst [0] : vector<32x128xf32> to vector<128xf32>
    %5 = vector.shape_cast %4 : vector<128xf32> to vector<1x128xf32>
    %cst_5 = arith.constant dense<0xFF800000> : vector<128xf32>
    %6 = vector.multi_reduction <maximumf>, %1, %cst_5 [0] : vector<32x128xf32> to vector<128xf32>
    %7 = vector.shape_cast %6 : vector<128xf32> to vector<1x128xf32>
    %8 = vector.broadcast %5 : vector<1x128xf32> to vector<32x128xf32>
    %9 = arith.subf %1, %8 : vector<32x128xf32>
    %10 = arith.subf %7, %5 : vector<1x128xf32>
    %cst_6 = arith.constant 9.99999993E-9 : f32
    %11 = vector.broadcast %cst_6 : f32 to vector<1x128xf32>
    %12 = arith.addf %10, %11 : vector<1x128xf32>
    %13 = tpu.reciprocal %12 {approx = true} : vector<1x128xf32> -> vector<1x128xf32>
    %14 = vector.broadcast %13 : vector<1x128xf32> to vector<32x128xf32>
    %15 = arith.mulf %9, %14 : vector<32x128xf32>
    %cst_7 = arith.constant dense<0x7F800000> : vector<1xf32>
    %16 = vector.multi_reduction <minimumf>, %3, %cst_7 [0] : vector<32x1xf32> to vector<1xf32>
    %17 = vector.shape_cast %16 : vector<1xf32> to vector<1x1xf32>
    %cst_8 = arith.constant dense<0xFF800000> : vector<1xf32>
    %18 = vector.multi_reduction <maximumf>, %3, %cst_8 [0] : vector<32x1xf32> to vector<1xf32>
    %19 = vector.shape_cast %18 : vector<1xf32> to vector<1x1xf32>
    %20 = vector.broadcast %17 : vector<1x1xf32> to vector<32x1xf32>
    %21 = arith.subf %3, %20 : vector<32x1xf32>
    %22 = arith.subf %19, %17 : vector<1x1xf32>
    %cst_9 = arith.constant 9.99999993E-9 : f32
    %23 = vector.broadcast %cst_9 : f32 to vector<1x1xf32>
    %24 = arith.addf %22, %23 : vector<1x1xf32>
    %25 = tpu.reciprocal %24 {approx = true} : vector<1x1xf32> -> vector<1x1xf32>
    %26 = vector.broadcast %25 : vector<1x1xf32> to vector<32x1xf32>
    %27 = arith.mulf %21, %26 : vector<32x1xf32>
    %cst_10 = arith.constant 1.000000e-07 : f32
    %28 = vector.broadcast %cst_10 : f32 to vector<32x1xf32>
    %29 = arith.addf %27, %28 : vector<32x1xf32>
    %cst_11 = arith.constant 1.000000e-07 : f32
    %30 = vector.broadcast %cst_11 : f32 to vector<32x128xf32>
    %31 = arith.addf %15, %30 : vector<32x128xf32>
    %cst_12 = arith.constant dense<0.000000e+00> : vector<1xf32>
    %32 = vector.multi_reduction <add>, %29, %cst_12 [0] : vector<32x1xf32> to vector<1xf32>
    %33 = vector.shape_cast %32 : vector<1xf32> to vector<1x1xf32>
    %34 = tpu.reciprocal %33 {approx = true} : vector<1x1xf32> -> vector<1x1xf32>
    %35 = vector.broadcast %34 : vector<1x1xf32> to vector<32x1xf32>
    %36 = arith.mulf %29, %35 : vector<32x1xf32>
    %cst_13 = arith.constant dense<0.000000e+00> : vector<128xf32>
    %37 = vector.multi_reduction <add>, %31, %cst_13 [0] : vector<32x128xf32> to vector<128xf32>
    %38 = vector.shape_cast %37 : vector<128xf32> to vector<1x128xf32>
    %39 = tpu.reciprocal %38 {approx = true} : vector<1x128xf32> -> vector<1x128xf32>
    %40 = vector.broadcast %39 : vector<1x128xf32> to vector<32x128xf32>
    %41 = arith.mulf %31, %40 : vector<32x128xf32>
    %42 = math.log %36 : vector<32x1xf32>
    %43 = math.log %41 : vector<32x128xf32>
    %44 = vector.broadcast %42 : vector<32x1xf32> to vector<32x128xf32>
    %45 = arith.subf %44, %43 : vector<32x128xf32>
    %46 = vector.broadcast %36 : vector<32x1xf32> to vector<32x128xf32>
    %47 = arith.subf %46, %41 : vector<32x128xf32>
    %48 = arith.mulf %47, %45 : vector<32x128xf32>
    %cst_14 = arith.constant dense<0.000000e+00> : vector<128xf32>
    %49 = vector.multi_reduction <add>, %48, %cst_14 [0] : vector<32x128xf32> to vector<128xf32>
    %50 = vector.shape_cast %49 : vector<128xf32> to vector<1x128xf32>
    %51 = vector.broadcast %27 : vector<32x1xf32> to vector<32x128xf32>
    %52 = arith.mulf %51, %15 : vector<32x128xf32>
    %cst_15 = arith.constant dense<0.000000e+00> : vector<128xf32>
    %53 = vector.multi_reduction <add>, %52, %cst_15 [0] : vector<32x128xf32> to vector<128xf32>
    %54 = vector.shape_cast %53 : vector<128xf32> to vector<1x128xf32>
    %55 = arith.mulf %27, %27 : vector<32x1xf32>
    %cst_16 = arith.constant dense<0.000000e+00> : vector<1xf32>
    %56 = vector.multi_reduction <add>, %55, %cst_16 [0] : vector<32x1xf32> to vector<1xf32>
    %57 = vector.shape_cast %56 : vector<1xf32> to vector<1x1xf32>
    %58 = arith.mulf %15, %15 : vector<32x128xf32>
    %cst_17 = arith.constant dense<0.000000e+00> : vector<128xf32>
    %59 = vector.multi_reduction <add>, %58, %cst_17 [0] : vector<32x128xf32> to vector<128xf32>
    %60 = vector.shape_cast %59 : vector<128xf32> to vector<1x128xf32>
    %61 = vector.broadcast %57 : vector<1x1xf32> to vector<1x128xf32>
    %62 = arith.mulf %61, %60 : vector<1x128xf32>
    %63 = math.rsqrt %62 : vector<1x128xf32>
    %64 = arith.mulf %54, %63 : vector<1x128xf32>
    %65 = arith.mulf %64, %64 : vector<1x128xf32>
    %cst_18 = arith.constant 1.000000e+00 : f32
    %66 = vector.broadcast %cst_18 : f32 to vector<1x128xf32>
    %67 = arith.subf %66, %65 : vector<1x128xf32>
    %cst_19 = arith.constant 0.000000e+00 : f32
    %68 = vector.broadcast %cst_19 : f32 to vector<1x128xf32>
    %69 = arith.maximumf %67, %68 : vector<1x128xf32>
    %70 = math.sqrt %69 : vector<1x128xf32>
    %71 = tpu.reciprocal %64 {approx = true} : vector<1x128xf32> -> vector<1x128xf32>
    %72 = arith.mulf %70, %71 : vector<1x128xf32>
    %73 = arith.mulf %50, %72 : vector<1x128xf32>
    %cst_20 = arith.constant 1.000000e+00 : f32
    %74 = vector.broadcast %cst_20 : f32 to vector<1x128xf32>
    %75 = arith.subf %74, %73 : vector<1x128xf32>
    %76 = math.absf %75 : vector<1x128xf32>
    %cst_21 = arith.constant 0x7F800000 : f32
    %77 = vector.broadcast %cst_21 : f32 to vector<1x128xf32>
    %78 = arith.cmpf olt, %76, %77 : vector<1x128xf32>
    %cst_22 = arith.constant 1.000000e+00 : f32
    %cst_23 = arith.constant 0x7FC00000 : f32
    %79 = vector.broadcast %cst_22 : f32 to vector<1x128xf32>
    %80 = vector.broadcast %cst_23 : f32 to vector<1x128xf32>
    %81 = arith.select %78, %79, %80 : vector<1x128xi1>, vector<1x128xf32>
    %c0_24 = arith.constant 0 : index
    %c0_25 = arith.constant 0 : index
    %c0_26 = arith.constant 0 : index
    %82 = vector.load %arg4[%c0_24, %c0_25, %c0_26] : memref<1x1x128xf32, #tpu.memory_space<vmem>>, vector<1x1x128xf32>
    %83 = vector.shape_cast %82 : vector<1x1x128xf32> to vector<1x128xf32>
    %84 = vector.shape_cast %81 : vector<1x128xf32> to vector<1x1x128xf32>
    tpu.vector_store %arg4[%c0_24, %c0_25, %c0_26], %84 {strides = array<i32>} : memref<1x1x128xf32, #tpu.memory_space<vmem>>, vector<1x1x128xf32>,
    return
  }
  func.func @transform_0(%arg0: i32, %arg1: i32) -> (i32, i32, i32) {
    %c0_i32 = arith.constant 0 : i32
    %c0_i32_0 = arith.constant 0 : i32
    return %arg0, %c0_i32, %arg1 : i32, i32, i32
  }
  func.func @transform_1(%arg0: i32, %arg1: i32) -> (i32, i32, i32) {
    %c0_i32 = arith.constant 0 : i32
    %c0_i32_0 = arith.constant 0 : i32
    %c0_i32_1 = arith.constant 0 : i32
    return %arg0, %c0_i32, %c0_i32_0 : i32, i32, i32
  }
  func.func @transform_2(%arg0: i32, %arg1: i32) -> (i32, i32, i32) {
    %c0_i32 = arith.constant 0 : i32
    %c0_i32_0 = arith.constant 0 : i32
    return %arg0, %c0_i32, %arg1 : i32, i32, i32
  }
}

</mosaic_0001>

<bundles_post_ra>
// kernel: tpu_custom_call.1
= control target key start
LH: loop header
LB: loop body
LE: loop exit
PB: predicated region body
PF: predicated region fallthrough
CT: control target
= control target key end

     0   :  { %7 = vsyncpa [#allocation3], 0  ;;  %s899_s0 = inlined_call_operand.vmem [shape: f32[2,32,128], index: 0, kind: input, shape index: {}]   ;;  %s900_s1 = inlined_call_operand.vmem [shape: f32[2,32,1], index: 1, kind: input, shape index: {}]   ;;  %s901_s2 = inlined_call_operand.hbm [shape: f32[2,1,128], index: 2, kind: output, shape index: {}]  }
   0x1   :  { %9 = vsyncpa [#allocation3 + $0x1], 0  ;;  %s762_s9 = smov 0   ;;  %s764_s10 = smov 0  }
   0x2   :  { %s766_s11 = smov 0   ;;  %s768_s12 = smov 0  }
   0x3   :  { %s770_s13 = smov 0   ;;  %s772_s14 = smov 0  }
   0x4 LB: > { %s563_s15 = sadd.s32 4294967295, %s742_s14   ;;  %s564_s16 = sadd.s32 4294967294, %s742_s14   ;;  %s742_s14 = sphi %s772_s14, %s15_s14   ;;  %s738_s13 = sphi %s770_s13, %s908_s13   ;;  %s734_s12 = sphi %s768_s12, %s907_s12   ;;  %s730_s11 = sphi %s766_s11, %s906_s11   ;;  %s726_s10 = sphi %s764_s10, %s905_s10   ;;  %s722_s9 = sphi %s762_s9, %s904_s9  }
   0x5   : > { %s27_s17 = sadd.s32 1, %s738_s13  ;;  %s90_s18 = sadd.s32 1, %s730_s11 }
   0x6   : > { %p29_p0 = scmp.ge.s32.totalorder %s27_s17, 2  ;;  %p100_p1 = scmp.ne.s32.totalorder %s730_s11, %s726_s10 }
   0x7   : > { %p101_p2 = scmp.eq.s32.totalorder %s563_s15, 1  ;;  %p106_p3 = scmp.ne.s32.totalorder %s726_s10, %s722_s9 }
   0x8   : > { %s910_s17 = smov (%p29_p0, %s27_s17), 0  ;;  %p107_p5 = scmp.eq.s32.totalorder %s564_s16, 1 }
   0x9   : > { %p802_p4 = por %p101_p2, %p100_p1  ;;  %s85_s20 = ssub.s32 %s738_s13, %s910_s17 }
   0xa   : > { %p567_p6 = scmp.ge.s32.totalorder %s742_s14, 1  ;;  %p88_p7 = scmp.eq.s32.totalorder %s85_s20, 0 }
   0xb   : > { %p809_p8 = por %p107_p5, %p106_p3  ;;  %p144_p9 = scmp.lt.s32.totalorder %s742_s14, 3 }
   0xc   : > { %s815_s22 = scalar_select %p88_p7, %s730_s11, %s90_s18  }
   0xd   : > { %p145_p10 = pnand %p567_p6, %p144_p9 }
   0xe   : > { %p173_p11 = scmp.lt.s32.totalorder (!%p145_p10), %s734_s12, 1  ;;  %s171_s3 = sand.u32 (!%p145_p10), 1, %s726_s10  }
   0xf   : > { %148 = sbr.rel (%p145_p10) target bundleno = 290 (0x122), region = 28  ;;  %s572_s4 = sshll.u32 (!%p145_p10), %s734_s12, 4 }
  0x10   : > { %s172_s5 = scalar_lea.vmem (!%p145_p10), [#allocation2], %s171_s3  ;;  %s853_s15 = scalar_lea.hbm (!%p145_p10), %s901_s2, %s572_s4 }
  0x11   : > { %s481_s6 = sshll.u32 (!%p145_p10), %s172_s5, 4  ;;  %s468_s16 = scalar_lea.sflag (!%p145_p10), [#allocation3], %s171_s3  ;;  %s855_s6 = int_to_ptr.vmem [resolvable:$true] %s481_s6 }
  0x12   : > { %s666_s18 = scalar_lea.vmem (!%p145_p10), %s855_s6, 16 }
  0x13   : > { %p667_p12 = scmp.ne.s32.totalorder (!%p145_p10), %s855_s6, %s666_s18 }
  0x14   : > { %v744_v0 = vmov 0   ;;  %s819_s23 = scalar_select %p173_p11, %s734_s12, 1  ;;  %vm223_vm0 = vcmask 7168  }
  0x15   : > { %634 = vset.pattern.permute.xlu0 %v744_v0  ;;  %635 = vset.pattern.permute.xlu1 %v744_v0  ;;  %p668_p13 = pnand %p667_p12, %p802_p4  ;;  %s746_s12 = smov [#allocation2]  }
  0x16   : > { %s575_s24 = sshll.u32 %s819_s23, 5  ;;  %s670_s20 = sshll.u32 %s746_s12, 4  ;;  %s671_s20 = int_to_ptr.vmem [resolvable:$false] %s670_s20 }
  0x17   : > { %s185_s27 = scalar_lea.vmem %s900_s1, %s575_s24  ;;  %s180_s30 = scalar_lea.vmem %s899_s0, %s575_s24 }
  0x18   : > { %v190_v1 = vld [vmem:[%s185_s27] sm:$0xff]  ;;  %v191_v2 = vld [vmem:[%s185_s27 + $0x8] sm:$0xff]  ;;  %v192_v3 = vld [vmem:[%s185_s27 + $0x10] sm:$0xff]  ;;  %p669_p0 = pneg %p668_p13  ;;  %s672_s23 = scalar_lea.vmem %s671_s20, 32 }
  0x19   : > { %v193_v4 = vld [vmem:[%s185_s27 + $0x18] sm:$0xff]  ;;  %v224_v5 = vsel %vm223_vm0, %v190_v1, inf  ;;  %v225_v6 = vsel %vm223_vm0, %v191_v2, inf  ;;  %v226_v7 = vsel %vm223_vm0, %v192_v3, inf  ;;  %v237_v8 = vsel %vm223_vm0, %v190_v1, -inf  ;;  %p673_p1 = scmp.lt.s32.totalorder %s855_s6, %s671_s20  ;;  %p674_p2 = scmp.lt.s32.totalorder %s672_s23, %s666_s18 }
  0x1a   : > { %v227_v9 = vsel %vm223_vm0, %v193_v4, inf  ;;  %v228_v10 = vmin.f32 %v224_v5, %v225_v6  ;;  %v238_v11 = vsel %vm223_vm0, %v191_v2, -inf  ;;  %v239_v12 = vsel %vm223_vm0, %v192_v3, -inf }
  0x1b   : > { %v229_v13 = vmin.f32 %v226_v7, %v227_v9  ;;  %v240_v14 = vsel %vm223_vm0, %v193_v4, -inf  ;;  %v241_v15 = vmax.f32 %v237_v8, %v238_v11  ;;  %p675_p3 = por %p674_p2, %p673_p1 }
  0x1c   : > { %v242_v16 = vmax.f32 %v239_v12, %v240_v14  ;;  %v186_v12 = vld [vmem:[%s180_s30] sm:$0xff] }
  0x1d   : > { %v230_v17 = vmin.f32 %v228_v10, %v229_v13  ;;  %v187_v13 = vld [vmem:[%s180_s30 + $0x8] sm:$0xff]  ;;  %p676_p5 = pnand %p675_p3, %p669_p0 }
  0x1e   : > { %v243_v18 = vmax.f32 %v241_v15, %v242_v16  ;;  %v188_v15 = vld [vmem:[%s180_s30 + $0x10] sm:$0xff]  ;;  %v189_v16 = vld [vmem:[%s180_s30 + $0x18] sm:$0xff] }
  0x1f   : > { %v231_v19 = vrot.slane %v230_v17, 4 }
  0x20   : > { %v244_v20 = vrot.slane %v243_v18, 4 }
  0x21   : > { %v232_v21 = vmin.f32 %v230_v17, %v231_v19 }
  0x22   : > { %v245_v22 = vmax.f32 %v243_v18, %v244_v20  ;;  %v194_v20 = vmin.f32 %v186_v12, %v187_v13 }
  0x23   : > { %v233_v23 = vrot.slane %v232_v21, 2 }
  0x24   : > { %v246_v24 = vrot.slane %v245_v22, 2 }
  0x25   : > { %v234_v25 = vmin.f32 %v232_v21, %v233_v23  ;;  %v195_v21 = vmin.f32 %v188_v15, %v189_v16  ;;  %v204_v23 = vmax.f32 %v188_v15, %v189_v16 }
  0x26   : > { %v247_v26 = vmax.f32 %v245_v22, %v246_v24  ;;  %v203_v22 = vmax.f32 %v186_v12, %v187_v13 }
  0x27   : > { %v235_v27 = vrot.slane %v234_v25, 1 }
  0x28   : > { %v248_v28 = vrot.slane %v247_v26, 1 }
  0x29   : > { %v236_v29 = vmin.f32 %v234_v25, %v235_v27  ;;  %v196_v25 = vmin.f32 %v194_v20, %v195_v21 }
  0x2a   : > { %v249_v30 = vmax.f32 %v247_v26, %v248_v28  ;;  %v205_v26 = vmax.f32 %v203_v22, %v204_v23 }
  0x2b   : > { %v250_v33 = vsub.f32 %v190_v1, %v236_v29  ;;  %v252_v34 = vsub.f32 %v192_v3, %v236_v29  ;;  %v251_v35 = vsub.f32 %v191_v2, %v236_v29  ;;  %v253_v36 = vsub.f32 %v193_v4, %v236_v29 }
  0x2c   : > { %v254_v31 = vsub.f32 %v249_v30, %v236_v29  ;;  %v197_v27 = vrot.slane %v196_v25, 4  ;;  %v206_v28 = vrot.slane %v205_v26, 4 }
  0x2e   : > { %v255_v32 = vadd.f32 1e-08, %v254_v31  ;;  %v198_v29 = vmin.f32 %v196_v25, %v197_v27  ;;  %v207_v30 = vmax.f32 %v205_v26, %v206_v28 }
  0x30   : > { %636 = vrcp.f32 %v255_v32 }
  0x3d   : > { %v637_v37 = vpop.eup %636 }
  0x3e   : > { %v257_v38 = vmul.f32 %v637_v37, %v250_v33  ;;  %v259_v39 = vmul.f32 %v637_v37, %v252_v34  ;;  %v258_v40 = vmul.f32 %v637_v37, %v251_v35  ;;  %v260_v41 = vmul.f32 %v637_v37, %v253_v36 }
  0x3f   : > { %v199_v36 = vrot.slane %v198_v29, 2  ;;  %v208_v37 = vrot.slane %v207_v30, 2 }
  0x40   : > { %380 = vperm.xlu0 %634, %v257_v38   ;;  %v261_v42 = vadd.f32 1e-07, %v257_v38  ;;  %v411_v43 = vmul.f32 %v257_v38, %v257_v38  ;;  %390 = vperm.xlu1 %635, %v259_v39   ;;  %v263_v44 = vadd.f32 1e-07, %v259_v39  ;;  %v413_v45 = vmul.f32 %v259_v39, %v259_v39 }
  0x41   : > { %v412_v46 = vmul.f32 %v258_v40, %v258_v40  ;;  %v264_v47 = vadd.f32 1e-07, %v260_v41  ;;  %v414_v48 = vmul.f32 %v260_v41, %v260_v41  ;;  %v262_v49 = vadd.f32 1e-07, %v258_v40 }
  0x42   : > { %v415_v50 = vsel %vm223_vm0, %v411_v43, 0.0  ;;  %v269_v51 = vsel %vm223_vm0, %v261_v42, 0.0  ;;  %v272_v52 = vsel %vm223_vm0, %v263_v44, 0.0  ;;  %v418_v53 = vsel %vm223_vm0, %v413_v45, 0.0 }
  0x43   : > { %v416_v54 = vsel %vm223_vm0, %v412_v46, 0.0  ;;  %v270_v55 = vsel %vm223_vm0, %v262_v49, 0.0  ;;  %v274_v58 = vsel %vm223_vm0, %v264_v47, 0.0  ;;  %v420_v59 = vsel %vm223_vm0, %v414_v48, 0.0 }
  0x44   : > { %385 = vperm.xlu0 %634, %v258_v40   ;;  %v417_v56 = vadd.f32 %v416_v54, %v415_v50  ;;  %395 = vperm.xlu1 %635, %v260_v41   ;;  %v271_v57 = vadd.f32 %v270_v55, %v269_v51  ;;  %v200_v40 = vmin.f32 %v198_v29, %v199_v36 }
  0x45   : > { %v209_v41 = vmax.f32 %v207_v30, %v208_v37 }
  0x46   : > { %v419_v60 = vadd.f32 %v418_v53, %v417_v56  ;;  %v273_v61 = vadd.f32 %v272_v52, %v271_v57  ;;  %v201_v43 = vrot.slane %v200_v40, 1 }
  0x48   : > { %v421_v62 = vadd.f32 %v420_v59, %v419_v60  ;;  %v275_v63 = vadd.f32 %v274_v58, %v273_v61  ;;  %v202_v45 = vmin.f32 %v200_v40, %v201_v43 }
  0x4a   : > { %v422_v0 = vrot.slane %v421_v62, 4  ;;  %v276_v1 = vrot.slane %v275_v63, 4  ;;  %v213_v50 = vsub.f32 %v187_v13, %v202_v45  ;;  %v214_v53 = vsub.f32 %v188_v15, %v202_v45 }
  0x4b   : > { %v215_v56 = vsub.f32 %v189_v16, %v202_v45 }
  0x4c   : > { %v423_v2 = vadd.f32 %v422_v0, %v421_v62  ;;  %v277_v3 = vadd.f32 %v276_v1, %v275_v63 }
  0x4e   : > { %v424_v4 = vrot.slane %v423_v2, 2  ;;  %v278_v5 = vrot.slane %v277_v3, 2 }
  0x50   : > { %v425_v6 = vadd.f32 %v424_v4, %v423_v2  ;;  %v279_v7 = vadd.f32 %v278_v5, %v277_v3 }
  0x52   : > { %v426_v8 = vrot.slane %v425_v6, 1  ;;  %v280_v9 = vrot.slane %v279_v7, 1 }
  0x54   : > { %v427_v10 = vadd.f32 %v426_v8, %v425_v6  ;;  %v281_v11 = vadd.f32 %v280_v9, %v279_v7 }
  0x56   : > { %443 = vperm.xlu0 %634, %v427_v10   ;;  %638 = vrcp.f32 %v281_v11 }
  0x63   : > { %v639_v14 = vpop.eup %638 }
  0x64   : > { %v284_v17 = vmul.f32 %v639_v14, %v262_v49  ;;  %v283_v18 = vmul.f32 %v639_v14, %v261_v42  ;;  %v285_v19 = vmul.f32 %v639_v14, %v263_v44  ;;  %v286_v24 = vmul.f32 %v639_v14, %v264_v47 }
  0x65   : > { %v210_v44 = vrot.slane %v209_v41, 1  ;;  %v212_v49 = vsub.f32 %v186_v12, %v202_v45 }
  0x66   : > { %348 = vperm.xlu0 %634, %v284_v17   ;;  %640 = vlog2.f32 %v284_v17  ;;  %343 = vperm.xlu1 %635, %v283_v18  }
  0x67   : > { %642 = vlog2.f32 %v283_v18  ;;  %v211_v46 = vmax.f32 %v209_v41, %v210_v44 }
  0x68   : > { %644 = vlog2.f32 %v285_v19 }
  0x69   : > { %646 = vlog2.f32 %v286_v24  ;;  %v216_v47 = vsub.f32 %v211_v46, %v202_v45 }
  0x6a   : > { %353 = vperm.xlu0 %634, %v285_v19  }
  0x6b   : > { %v217_v48 = vadd.f32 1e-08, %v216_v47 }
  0x6d   : > { %648 = vrcp.f32 %v217_v48 }
  0x73   : > { %v641_v31 = vpop.eup %640 }
  0x74   : > { %v643_v32 = vpop.eup %642  ;;  %v304_v33 = vmul.f32 0.6931472, %v641_v31 }
  0x75   : > { %v645_v34 = vpop.eup %644  ;;  %v302_v35 = vmul.f32 0.6931472, %v643_v32 }
  0x76   : > { %324 = vperm.xlu0 %634, %v304_v33   ;;  %v306_v38 = vmul.f32 0.6931472, %v645_v34  ;;  %v647_v39 = vpop.eup %646 }
  0x77   : > { %319 = vperm.xlu1 %635, %v302_v35   ;;  %v308_v42 = vmul.f32 0.6931472, %v647_v39 }
  0x7a   : > { %358 = vperm.xlu0 %634, %v286_v24   ;;  %v649_v51 = vpop.eup %648 }
  0x7b   : > { %329 = vperm.xlu1 %635, %v306_v38   ;;  %v219_v52 = vmul.f32 %v649_v51, %v212_v49  ;;  %v220_v54 = vmul.f32 %v649_v51, %v213_v50  ;;  %v221_v55 = vmul.f32 %v649_v51, %v214_v53  ;;  %v222_v59 = vmul.f32 %v649_v51, %v215_v56 }
  0x7d   : > { %v265_v57 = vadd.f32 1e-07, %v219_v52  ;;  %v266_v58 = vadd.f32 1e-07, %v220_v54  ;;  %v267_v60 = vadd.f32 1e-07, %v221_v55  ;;  %v428_v62 = vmul.f32 %v219_v52, %v219_v52 }
  0x7e   : > { %v429_v63 = vmul.f32 %v220_v54, %v220_v54  ;;  %v268_v0 = vadd.f32 1e-07, %v222_v59  ;;  %v430_v2 = vmul.f32 %v221_v55, %v221_v55  ;;  %v431_v5 = vmul.f32 %v222_v59, %v222_v59 }
  0x7f   : > { %334 = vperm.xlu1 %635, %v308_v42   ;;  %v287_v61 = vadd.f32 %v266_v58, %v265_v57 }
  0x80   : > { %v432_v3 = vadd.f32 %v429_v63, %v428_v62 }
  0x81   : > { %v288_v1 = vadd.f32 %v287_v61, %v267_v60 }
  0x82   : > { %v433_v6 = vadd.f32 %v432_v3, %v430_v2 }
  0x83   : > { %v289_v4 = vadd.f32 %v288_v1, %v268_v0 }
  0x84   : > { %v434_v8 = vadd.f32 %v433_v6, %v431_v5 }
  0x85   : > { %v290_v7 = vrot.slane %v289_v4, 4 }
  0x86   : > { %v435_v10 = vrot.slane %v434_v8, 4 }
  0x87   : > { %v291_v9 = vadd.f32 %v290_v7, %v289_v4 }
  0x88   : > { %v436_v15 = vadd.f32 %v435_v10, %v434_v8 }
  0x89   : > { %v292_v11 = vrot.slane %v291_v9, 2 }
  0x8a   : > { %v437_v23 = vrot.slane %v436_v15, 2 }
  0x8b   : > { %v293_v16 = vadd.f32 %v292_v11, %v291_v9 }
  0x8c   : > { %v438_v27 = vadd.f32 %v437_v23, %v436_v15 }
  0x8d   : > { %v294_v24 = vrot.slane %v293_v16, 1 }
  0x8e   : > { %v439_v30 = vrot.slane %v438_v27, 1 }
  0x8f   : > { %v295_v28 = vadd.f32 %v294_v24, %v293_v16 }
  0x90   : > { %v440_v32 = vadd.f32 %v439_v30, %v438_v27 }
  0x91   : > { %650 = vrcp.f32 %v295_v28 }
  0x9e   : > { %v651_v37 = vpop.eup %650 }
  0x9f   : > { %v298_v39 = vmul.f32 %v651_v37, %v266_v58  ;;  %v297_v40 = vmul.f32 %v651_v37, %v265_v57  ;;  %v299_v42 = vmul.f32 %v651_v37, %v267_v60  ;;  %v300_v45 = vmul.f32 %v651_v37, %v268_v0 }
  0xbb   : > { %v381_v12 = vpop.permute.xlu0 %380  ;;  %v391_v13 = vpop.permute.xlu1 %390 }
  0xbc   : > { %v398_v14 = vmul.f32 %v381_v12, %v219_v52  ;;  %v400_v19 = vmul.f32 %v391_v13, %v221_v55 }
  0xbf   : > { %v386_v17 = vpop.permute.xlu0 %385  ;;  %v396_v18 = vpop.permute.xlu1 %395 }
  0xc0   : > { %v399_v20 = vmul.f32 %v386_v17, %v220_v54  ;;  %v401_v22 = vmul.f32 %v396_v18, %v222_v59 }
  0xc2   : > { %v402_v21 = vadd.f32 %v399_v20, %v398_v14 }
  0xc4   : > { %v403_v25 = vadd.f32 %v402_v21, %v400_v19 }
  0xc6   : > { %v404_v26 = vadd.f32 %v403_v25, %v401_v22 }
  0xc8   : > { %v405_v29 = vrot.slane %v404_v26, 4 }
  0xca   : > { %v406_v31 = vadd.f32 %v405_v29, %v404_v26 }
  0xcc   : > { %v407_v34 = vrot.slane %v406_v31, 2 }
  0xce   : > { %v408_v36 = vadd.f32 %v407_v34, %v406_v31 }
  0xd0   : > { %v409_v38 = vrot.slane %v408_v36, 1 }
  0xd1   : > { %v444_v33 = vpop.permute.xlu0 %443 }
  0xd2   : > { %v446_v35 = vmul.f32 %v444_v33, %v440_v32  ;;  %v410_v41 = vadd.f32 %v409_v38, %v408_v36  ;;  %v745_v32 = vmov nan  }
  0xd4   : > { %652 = vrsqrt.f32 %v446_v35 }
  0xd5   : > { %654 = vlog2.f32 %v298_v39 }
  0xd6   : > { %656 = vlog2.f32 %v297_v40 }
  0xd7   : > { %658 = vlog2.f32 %v299_v42 }
  0xd8   : > { %660 = vlog2.f32 %v300_v45 }
  0xe1   : > { %v653_v43 = vpop.eup %652  ;;  %v349_v47 = vpop.permute.xlu0 %348 }
  0xe2   : > { %v448_v44 = vmul.f32 %v653_v43, %v410_v41  ;;  %v655_v49 = vpop.eup %654  ;;  %v344_v53 = vpop.permute.xlu1 %343  ;;  %v362_v63 = vsub.f32 %v349_v47, %v298_v39 }
  0xe3   : > { %v657_v50 = vpop.eup %656  ;;  %v312_v54 = vmul.f32 0.6931472, %v655_v49  ;;  %v361_v0 = vsub.f32 %v344_v53, %v297_v40 }
  0xe4   : > { %v449_v46 = vmul.f32 %v448_v44, %v448_v44  ;;  %v310_v55 = vmul.f32 0.6931472, %v657_v50  ;;  %v659_v56 = vpop.eup %658 }
  0xe5   : > { %v354_v52 = vpop.permute.xlu0 %353  ;;  %v661_v59 = vpop.eup %660  ;;  %v314_v62 = vmul.f32 0.6931472, %v659_v56 }
  0xe6   : > { %v450_v48 = vsub.f32 1.0, %v449_v46  ;;  %v316_v2 = vmul.f32 0.6931472, %v661_v59  ;;  %v363_v3 = vsub.f32 %v354_v52, %v299_v42 }
  0xe8   : > { %v451_v51 = vmax.f32 %v450_v48, 0.0 }
  0xea   : > { %662 = vrsqrt.f32 %v451_v51  ;;  %vm454_vm1 = vcmp.eq.f32.partialorder %v451_v51, inf  ;;  %v457_v22 = vand.u32 2147483648, %v451_v51  ;;  %vm456_vm2 = vcmp.eq.f32.partialorder %v451_v51, 0.0 }
  0xeb   : > { %664 = vrcp.f32 %v448_v44 }
  0xf1   : > { %v325_v57 = vpop.permute.xlu0 %324 }
  0xf2   : > { %v320_v58 = vpop.permute.xlu1 %319  ;;  %v338_v60 = vsub.f32 %v325_v57, %v312_v54 }
  0xf3   : > { %v337_v61 = vsub.f32 %v320_v58, %v310_v55 }
  0xf4   : > { %v366_v4 = vmul.f32 %v362_v63, %v338_v60 }
  0xf5   : > { %v365_v5 = vmul.f32 %v361_v0, %v337_v61  ;;  %v359_v7 = vpop.permute.xlu0 %358 }
  0xf6   : > { %v330_v1 = vpop.permute.xlu1 %329  ;;  %v364_v11 = vsub.f32 %v359_v7, %v300_v45 }
  0xf7   : > { %v339_v6 = vsub.f32 %v330_v1, %v314_v62  ;;  %v369_v10 = vadd.f32 %v366_v4, %v365_v5  ;;  %v663_v15 = vpop.eup %662 }
  0xf8   : > { %v453_v18 = vmul.f32 %v663_v15, %v451_v51  ;;  %v665_v26 = vpop.eup %664 }
  0xf9   : > { %v367_v8 = vmul.f32 %v363_v3, %v339_v6 }
  0xfa   : > { %v335_v9 = vpop.permute.xlu1 %334  ;;  %v455_v21 = vsel %vm454_vm1, %v451_v51, %v453_v18 }
  0xfb   : > { %v340_v12 = vsub.f32 %v335_v9, %v316_v2  ;;  %v370_v13 = vadd.f32 %v369_v10, %v367_v8  ;;  %v458_v24 = vsel %vm456_vm2, %v457_v22, %v455_v21 }
  0xfc   : > { %v460_v28 = vmul.f32 %v665_v26, %v458_v24 }
  0xfd   : > { %v368_v14 = vmul.f32 %v364_v11, %v340_v12 }
  0xff   : > { %v371_v16 = vadd.f32 %v370_v13, %v368_v14 }
 0x101   : > { %v372_v17 = vrot.slane %v371_v16, 4 }
 0x103   : > { %v373_v19 = vadd.f32 %v372_v17, %v371_v16 }
 0x105   : > { %v374_v20 = vrot.slane %v373_v19, 2 }
 0x107   : > { %v375_v23 = vadd.f32 %v374_v20, %v373_v19 }
 0x109   : > { %v376_v25 = vrot.slane %v375_v23, 1 }
 0x10b   : > { %v377_v27 = vadd.f32 %v376_v25, %v375_v23 }
 0x10d   : > { %v461_v29 = vmul.f32 %v460_v28, %v377_v27 }
 0x10f   : > { %v462_v30 = vsub.f32 1.0, %v461_v29 }
 0x111   : > { %v463_v31 = vand.u32 2147483647, %v462_v30 }
 0x113   : > { %vm464_vm3 = vcmp.lt.f32.partialorder %v463_v31, inf }
 0x114   : > { %v465_v33 = vsel %vm464_vm3, 1.0, %v745_v32 }
 0x115   : > { %466 = vst [vmem:[%s172_s5] sm:$0x1] %v465_v33 }
 0x116   : > { %679 = shalt.err (!%p676_p5)
}
 0x117   : > { %s680_s24 = scalar_lea.hbm %s853_s15, 16  ;;  %s684_s27 = scalar_lea.hbm %s901_s2, 32 }
 0x118   : > { %p681_p6 = scmp.ne.s32.totalorder %s853_s15, %s680_s24  ;;  %p685_p10 = scmp.lt.s32.totalorder %s853_s15, %s901_s2 }
 0x119   : > { %p686_p11 = scmp.lt.s32.totalorder %s684_s27, %s680_s24 }
 0x11a   : > { %p682_p7 = pnand %p681_p6, %p802_p4 }
 0x11b   : > { %p687_p12 = por %p686_p11, %p685_p10 }
 0x11c   : > { %p683_p9 = pneg %p682_p7 }
 0x11e   : > { %p688_p13 = pnand %p687_p12, %p683_p9 }
 0x120   : > { %691 = shalt.err (!%p688_p13)
}
 0x121   : > { %577 = dma.vmem_to_hbm [thread:$0]  (%p802_p4), %s855_s6, 16, %s853_s15, %s468_s16  }
 0x122 PF: > { %p583_p0 = scmp.ge.s32.totalorder %s742_s14, 2  ;;  %s493_s30 = sand.u32 1, %s722_s9  }
 0x123   : > { %s494_s3 = scalar_lea.sflag [#allocation3], %s493_s30 }
 0x124   : > { %p580_p1 = pnand %p583_p0, %p809_p8 }
 0x126   : > { %p581_p2 = pneg %p580_p1 }
 0x128   : > { %717 = dma.done.wait (%p581_p2), %s494_s3, 16  }
 0x129   : > { %719 = vsyncadd (%p581_p2), %s494_s3, 4294967280  ;;  %s15_s14 = sadd.s32 1, %s742_s14   ;;  %s904_s9 = smov %s726_s10 }
 0x12a   : > { %p12_p3 = scmp.ge.s32.totalorder %s15_s14, 4   ;;  %s905_s10 = smov %s730_s11 }
 0x12b   : > { %s906_s11 = smov %s815_s22  ;;  %s907_s12 = smov %s738_s13 }
 0x12c   : > { %s908_s13 = smov %s910_s17  ;;  %14 = sbr.rel (!%p12_p3) target bundleno = 4 (0x4), region = 66 }
 0x131   :  { %498 = vsyncpa [#allocation3], 1 }
 0x132   :  { %500 = vsyncpa [#allocation3 + $0x1], 1 }

</bundles_post_ra>
